<compile_context>
chip_gen: v7x
topology: tpu7x:2x2x1
jax: 0.10.0
libtpu: 0.0.40
codegen_flags: <defaults>
</compile_context>

<pallas_src>
import jax
import jax.numpy as jnp
from jax.experimental import pallas as pl
from jax.experimental.pallas import tpu as pltpu

LATENT_DIM = 3
NUM_CLASSES = 10
EMB_DIM = 16
HIDDEN_DIM = 128
OUT_DIM = 28 * 28          # 784
MAX_BATCH_TILE = 1024


def _round_up(x, m):
    return ((x + m - 1) // m) * m


def _cdiv(a, b):
    return (a + b - 1) // b


def _decoder_kernel(
    latent_ref,   # (TB, LATENT_DIM) f32
    label_ref,    # (TB, 1) int32
    w2a_ref,      # (LATENT_DIM, HIDDEN_DIM) f32   latent rows of fc_hidden
    t_ref,        # (NUM_CLASSES, HIDDEN_DIM) f32  folded label table (incl. b2)
    w3_ref,       # (HIDDEN_DIM, OUT_DIM) bf16     fc_out weight
    b3_ref,       # (1, OUT_DIM) f32               fc_out bias
    out_ref,      # (TB, OUT_DIM) f32
):
    latent = latent_ref[...]                      # (TB, 3) f32
    label = label_ref[...]                        # (TB, 1) int32
    tb = latent.shape[0]

    # one_hot(label, 10).  NOTE: an out-of-range label silently produces an
    # all-zero row (PyTorch F.one_hot would raise) -> undefined behaviour.
    class_ids = jax.lax.broadcasted_iota(jnp.int32, (tb, NUM_CLASSES), 1)
    one_hot = (class_ids == label).astype(jnp.float32)   # (TB, 10)

    # Label contribution:  relu(one_hot@W1+b1)@W2b + b2  ==  one_hot @ T
    hidden = jnp.dot(one_hot, t_ref[...], preferred_element_type=jnp.float32)

    # Latent contribution: K=3 is too small for the MXU -> 3 VPU broadcast-FMAs.
    for k in range(LATENT_DIM):
        hidden = hidden + latent[:, k:k + 1] * w2a_ref[k:k + 1, :]

    hidden = jnp.maximum(hidden, 0.0)             # relu, f32, (TB, 128)

    # fc_out: bf16 operands on the MXU, f32 accumulation, f32 elementwise.
    logits = jnp.dot(hidden.astype(jnp.bfloat16), w3_ref[...],
                     preferred_element_type=jnp.float32)
    logits = logits + b3_ref[...]
    # sigmoid(x) == 0.5*tanh(0.5*x) + 0.5  (single EUP op per element)
    out_ref[...] = 0.5 * jnp.tanh(0.5 * logits) + 0.5


@jax.jit
def decoder_forward(latent_vector, label, params):
    """latent_vector: (B, 3) f32; label: (B,) int -> (B, 1, 28, 28) f32."""
    b = latent_vector.shape[0]
    w1, b1, w2, b2, w3, b3 = (
        params["w1"], params["b1"], params["w2"], params["b2"],
        params["w3"], params["b3"],
    )

    # ---- fold the whole label branch (and b2) into a (10, 128) table ------
    emb_table = jax.nn.relu(w1 + b1[None, :])            # (10, 16)
    t = emb_table @ w2[LATENT_DIM:, :] + b2[None, :]     # (10, 128)
    w2a = w2[:LATENT_DIM, :]                             # (3, 128)

    # ---- fc_out weights: bf16 for the MXU, f32 bias --------------------------
    w3_bf16 = w3.astype(jnp.bfloat16)                    # (128, 784)
    b3_2d = b3.reshape(1, OUT_DIM)                       # (1, 784)

    # ---- batch tiling: bound padding to <8 rows per tile ---------------------
    n_tiles = max(1, _cdiv(b, MAX_BATCH_TILE))
    if n_tiles > 1 and n_tiles % 2 == 1:
        n_tiles += 1          # even tile count -> both v7x TensorCores get work
    tb = _round_up(_cdiv(b, n_tiles), 8)
    b_pad = n_tiles * tb

    if b_pad != b:
        latent_p = jnp.zeros((b_pad, LATENT_DIM), jnp.float32)
        latent_p = latent_p.at[:b].set(latent_vector.astype(jnp.float32))
        label_p = jnp.zeros((b_pad, 1), jnp.int32)
        label_p = label_p.at[:b, 0].set(label.astype(jnp.int32))
    else:
        latent_p = latent_vector.astype(jnp.float32)
        label_p = label.astype(jnp.int32).reshape(b, 1)

    cost = pl.CostEstimate(
        flops=2 * b_pad * (NUM_CLASSES * HIDDEN_DIM + HIDDEN_DIM * OUT_DIM),
        transcendentals=b_pad * OUT_DIM,
        bytes_accessed=(HIDDEN_DIM * OUT_DIM * 2            # bf16 W3
                        + b_pad * (LATENT_DIM + 1) * 4      # latent + label
                        + b_pad * OUT_DIM * 4),             # output
    )

    out = pl.pallas_call(
        _decoder_kernel,
        out_shape=jax.ShapeDtypeStruct((b_pad, OUT_DIM), jnp.float32),
        grid=(n_tiles,),
        in_specs=[
            pl.BlockSpec((tb, LATENT_DIM), lambda i: (i, 0)),
            pl.BlockSpec((tb, 1), lambda i: (i, 0)),
            pl.BlockSpec((LATENT_DIM, HIDDEN_DIM), lambda i: (0, 0)),
            pl.BlockSpec((NUM_CLASSES, HIDDEN_DIM), lambda i: (0, 0)),
            pl.BlockSpec((HIDDEN_DIM, OUT_DIM), lambda i: (0, 0)),
            pl.BlockSpec((1, OUT_DIM), lambda i: (0, 0)),
        ],
        out_specs=pl.BlockSpec((tb, OUT_DIM), lambda i: (i, 0)),
        compiler_params=pltpu.CompilerParams(
            dimension_semantics=("parallel",)),
        cost_estimate=cost,
    )(latent_p, label_p, w2a, t, w3_bf16, b3_2d)

    if b_pad != b:
        out = out[:b]
    # (B, 784) -> (B, 1, 28, 28) is a layout-preserving (free) reshape.
    return out.reshape(b, 1, 28, 28)


def init_params(key):
    """Deterministic init mimicking nn.Linear's U(-1/sqrt(fan_in), +).

    Weights are stored transposed vs. PyTorch (as (in, out)) so forward does
    x @ W directly.
    """
    ks = jax.random.split(key, 6)

    def linear(kw, kb, fan_in, fan_out):
        bound = 1.0 / jnp.sqrt(float(fan_in))
        w = jax.random.uniform(kw, (fan_in, fan_out), jnp.float32, -bound, bound)
        b = jax.random.uniform(kb, (fan_out,), jnp.float32, -bound, bound)
        return w, b

    w1, b1 = linear(ks[0], ks[1], NUM_CLASSES, EMB_DIM)              # label_embedding
    w2, b2 = linear(ks[2], ks[3], LATENT_DIM + EMB_DIM, HIDDEN_DIM)  # fc_hidden
    w3, b3 = linear(ks[4], ks[5], HIDDEN_DIM, OUT_DIM)               # fc_out
    return {"w1": w1, "b1": b1, "w2": w2, "b2": b2, "w3": w3, "b3": b3}


def _reference_forward(latent_vector, label, params):
    """Pure-JAX f32 reference for correctness check."""
    one_hot = jax.nn.one_hot(label, NUM_CLASSES, dtype=jnp.float32)
    emb = jax.nn.relu(one_hot @ params["w1"] + params["b1"])
    cat = jnp.concatenate([latent_vector, emb], axis=1)
    hidden = jax.nn.relu(cat @ params["w2"] + params["b2"])
    out = jax.nn.sigmoid(hidden @ params["w3"] + params["b3"])
    return out.reshape(-1, 1, 28, 28)


if __name__ == "__main__":
    key = jax.random.PRNGKey(0)
    k_params, k_latent, k_label = jax.random.split(key, 3)

    params = init_params(k_params)

    batch = 8
    latent_vector = jax.random.normal(k_latent, (batch, LATENT_DIM), jnp.float32)
    label = jax.random.randint(k_label, (batch,), 0, NUM_CLASSES, jnp.int32)

    out = decoder_forward(latent_vector, label, params)
    out = jax.block_until_ready(out)

    ref = _reference_forward(latent_vector, label, params)
    assert out.shape == (batch, 1, 28, 28), out.shape
    # bf16 MXU operands for fc_out -> slightly looser tolerance than pure f32.
    assert jnp.allclose(out, ref, atol=2e-2, rtol=2e-2), (
        "mismatch vs reference, max abs diff = "
        f"{float(jnp.max(jnp.abs(out - ref)))}")

    print("KERNEL_OK")
</pallas_src>

<mosaic_0001>
module attributes {stable_mosaic.version = 11 : i64} {
  func.func @_decoder_kernel(%arg0: i32, %arg1: memref<8x3xf32, #tpu.memory_space<vmem>>, %arg2: memref<8x1xi32, #tpu.memory_space<vmem>>, %arg3: memref<3x128xf32, #tpu.memory_space<vmem>>, %arg4: memref<10x128xf32, #tpu.memory_space<vmem>>, %arg5: memref<128x784xbf16, #tpu.memory_space<vmem>>, %arg6: memref<1x784xf32, #tpu.memory_space<vmem>>, %arg7: memref<8x784xf32, #tpu.memory_space<vmem>>) attributes {dimension_semantics = [#tpu.dimension_semantics<parallel>], iteration_bounds = array<i64: 1>, scalar_prefetch = 0 : i64, scratch_operands = 0 : i64, tpu.core_type = #tpu.core_type<tc>, window_params = [{transform_indices = @transform_0, window_bounds = array<i64: 8, 3>}, {transform_indices = @transform_1, window_bounds = array<i64: 8, 1>}, {pipeline_mode = #tpu.pipeline_mode<synchronous>, transform_indices = @transform_2, window_bounds = array<i64: 3, 128>}, {pipeline_mode = #tpu.pipeline_mode<synchronous>, transform_indices = @transform_3, window_bounds = array<i64: 10, 128>}, {pipeline_mode = #tpu.pipeline_mode<synchronous>, transform_indices = @transform_4, window_bounds = array<i64: 128, 784>}, {pipeline_mode = #tpu.pipeline_mode<synchronous>, transform_indices = @transform_5, window_bounds = array<i64: 1, 784>}, {transform_indices = @transform_6, window_bounds = array<i64: 8, 784>}]} {
    %c0 = arith.constant 0 : index
    %c0_0 = arith.constant 0 : index
    %0 = vector.load %arg1[%c0, %c0_0] : memref<8x3xf32, #tpu.memory_space<vmem>>, vector<8x3xf32>
    %c0_1 = arith.constant 0 : index
    %c0_2 = arith.constant 0 : index
    %1 = vector.load %arg2[%c0_1, %c0_2] : memref<8x1xi32, #tpu.memory_space<vmem>>, vector<8x1xi32>
    %2 = tpu.iota {dimensions = array<i32: 1>} : vector<8x10xi32>
    %3 = vector.broadcast %1 : vector<8x1xi32> to vector<8x10xi32>
    %4 = arith.cmpi eq, %2, %3 : vector<8x10xi32>
    %5 = arith.extui %4 : vector<8x10xi1> to vector<8x10xi32>
    %6 = arith.sitofp %5 : vector<8x10xi32> to vector<8x10xf32>
    %c0_3 = arith.constant 0 : index
    %c0_4 = arith.constant 0 : index
    %7 = vector.load %arg4[%c0_3, %c0_4] : memref<10x128xf32, #tpu.memory_space<vmem>>, vector<10x128xf32>
    %cst = arith.constant dense<0.000000e+00> : vector<8x128xf32>
    %8 = tpu.matmul %6, %7, %cst {dimension_numbers = #tpu.dot_dimension_numbers<[1], [0], [0], [1], [0, 0, 1, 1], [], []>} : vector<8x10xf32>, vector<10x128xf32>, vector<8x128xf32> -> vector<8x128xf32>
    %9 = vector.extract_strided_slice %0 {offsets = [0, 0], sizes = [8, 1], strides = [1, 1]} : vector<8x3xf32> to vector<8x1xf32>
    %c0_5 = arith.constant 0 : index
    %c0_6 = arith.constant 0 : index
    %10 = vector.load %arg3[%c0_5, %c0_6] : memref<3x128xf32, #tpu.memory_space<vmem>>, vector<1x128xf32>
    %11 = vector.broadcast %9 : vector<8x1xf32> to vector<8x128xf32>
    %12 = vector.broadcast %10 : vector<1x128xf32> to vector<8x128xf32>
    %13 = arith.mulf %11, %12 : vector<8x128xf32>
    %14 = arith.addf %8, %13 : vector<8x128xf32>
    %15 = vector.extract_strided_slice %0 {offsets = [0, 1], sizes = [8, 1], strides = [1, 1]} : vector<8x3xf32> to vector<8x1xf32>
    %c1 = arith.constant 1 : index
    %c0_7 = arith.constant 0 : index
    %16 = vector.load %arg3[%c1, %c0_7] : memref<3x128xf32, #tpu.memory_space<vmem>>, vector<1x128xf32>
    %17 = vector.broadcast %15 : vector<8x1xf32> to vector<8x128xf32>
    %18 = vector.broadcast %16 : vector<1x128xf32> to vector<8x128xf32>
    %19 = arith.mulf %17, %18 : vector<8x128xf32>
    %20 = arith.addf %14, %19 : vector<8x128xf32>
    %21 = vector.extract_strided_slice %0 {offsets = [0, 2], sizes = [8, 1], strides = [1, 1]} : vector<8x3xf32> to vector<8x1xf32>
    %c2 = arith.constant 2 : index
    %c0_8 = arith.constant 0 : index
    %22 = vector.load %arg3[%c2, %c0_8] : memref<3x128xf32, #tpu.memory_space<vmem>>, vector<1x128xf32>
    %23 = vector.broadcast %21 : vector<8x1xf32> to vector<8x128xf32>
    %24 = vector.broadcast %22 : vector<1x128xf32> to vector<8x128xf32>
    %25 = arith.mulf %23, %24 : vector<8x128xf32>
    %26 = arith.addf %20, %25 : vector<8x128xf32>
    %cst_9 = arith.constant 0.000000e+00 : f32
    %27 = vector.broadcast %cst_9 : f32 to vector<8x128xf32>
    %28 = arith.maximumf %26, %27 : vector<8x128xf32>
    %29 = arith.truncf %28 : vector<8x128xf32> to vector<8x128xbf16>
    %c0_10 = arith.constant 0 : index
    %c0_11 = arith.constant 0 : index
    %30 = vector.load %arg5[%c0_10, %c0_11] : memref<128x784xbf16, #tpu.memory_space<vmem>>, vector<128x784xbf16>
    %cst_12 = arith.constant dense<0.000000e+00> : vector<8x784xf32>
    %31 = tpu.matmul %29, %30, %cst_12 {dimension_numbers = #tpu.dot_dimension_numbers<[1], [0], [0], [1], [0, 0, 1, 1], [], []>} : vector<8x128xbf16>, vector<128x784xbf16>, vector<8x784xf32> -> vector<8x784xf32>
    %c0_13 = arith.constant 0 : index
    %c0_14 = arith.constant 0 : index
    %32 = vector.load %arg6[%c0_13, %c0_14] : memref<1x784xf32, #tpu.memory_space<vmem>>, vector<1x784xf32>
    %33 = vector.broadcast %32 : vector<1x784xf32> to vector<8x784xf32>
    %34 = arith.addf %31, %33 : vector<8x784xf32>
    %cst_15 = arith.constant 5.000000e-01 : f32
    %35 = vector.broadcast %cst_15 : f32 to vector<8x784xf32>
    %36 = arith.mulf %35, %34 : vector<8x784xf32>
    %37 = math.tanh %36 : vector<8x784xf32>
    %cst_16 = arith.constant 5.000000e-01 : f32
    %38 = vector.broadcast %cst_16 : f32 to vector<8x784xf32>
    %39 = arith.mulf %38, %37 : vector<8x784xf32>
    %cst_17 = arith.constant 5.000000e-01 : f32
    %40 = vector.broadcast %cst_17 : f32 to vector<8x784xf32>
    %41 = arith.addf %39, %40 : vector<8x784xf32>
    %c0_18 = arith.constant 0 : index
    %c0_19 = arith.constant 0 : index
    %42 = vector.load %arg7[%c0_18, %c0_19] : memref<8x784xf32, #tpu.memory_space<vmem>>, vector<8x784xf32>
    tpu.vector_store %arg7[%c0_18, %c0_19], %41 {strides = array<i32>} : memref<8x784xf32, #tpu.memory_space<vmem>>, vector<8x784xf32>,
    return
  }
  func.func @transform_0(%arg0: i32) -> (i32, i32) {
    %c0_i32 = arith.constant 0 : i32
    %c0_i32_0 = arith.constant 0 : i32
    return %arg0, %c0_i32 : i32, i32
  }
  func.func @transform_1(%arg0: i32) -> (i32, i32) {
    %c0_i32 = arith.constant 0 : i32
    %c0_i32_0 = arith.constant 0 : i32
    return %arg0, %c0_i32 : i32, i32
  }
  func.func @transform_2(%arg0: i32) -> (i32, i32) {
    %c0_i32 = arith.constant 0 : i32
    %c0_i32_0 = arith.constant 0 : i32
    %c0_i32_1 = arith.constant 0 : i32
    return %c0_i32, %c0_i32_0 : i32, i32
  }
  func.func @transform_3(%arg0: i32) -> (i32, i32) {
    %c0_i32 = arith.constant 0 : i32
    %c0_i32_0 = arith.constant 0 : i32
    %c0_i32_1 = arith.constant 0 : i32
    return %c0_i32, %c0_i32_0 : i32, i32
  }
  func.func @transform_4(%arg0: i32) -> (i32, i32) {
    %c0_i32 = arith.constant 0 : i32
    %c0_i32_0 = arith.constant 0 : i32
    %c0_i32_1 = arith.constant 0 : i32
    return %c0_i32, %c0_i32_0 : i32, i32
  }
  func.func @transform_5(%arg0: i32) -> (i32, i32) {
    %c0_i32 = arith.constant 0 : i32
    %c0_i32_0 = arith.constant 0 : i32
    %c0_i32_1 = arith.constant 0 : i32
    return %c0_i32, %c0_i32_0 : i32, i32
  }
  func.func @transform_6(%arg0: i32) -> (i32, i32) {
    %c0_i32 = arith.constant 0 : i32
    %c0_i32_0 = arith.constant 0 : i32
    return %arg0, %c0_i32 : i32, i32
  }
}

</mosaic_0001>

<bundles_post_ra>
// kernel: decoder_forward.1
= control target key start
LH: loop header
LB: loop body
LE: loop exit
PB: predicated region body
PF: predicated region fallthrough
CT: control target
= control target key end

     0   :  { %vm51_vm0 = vcmask 1041408   ;;  %v951_v0 = vmov 0   ;;  %v952_v2 = vmov 0.0|0.0   ;;  %vm953_vm1 = vmmov 1   ;;  %s1225_s1 = inlined_call_operand.vmem [shape: s32[8,1], index: 1, kind: input, shape index: {}]   ;;  %s1226_s0 = inlined_call_operand.vmem [shape: f32[8,3], index: 0, kind: input, shape index: {}]   ;;  %s1227_s3 = inlined_call_operand.vmem [shape: f32[10,128], index: 3, kind: input, shape index: {}]   ;;  %s1228_s4 = inlined_call_operand.vmem [shape: bf16[128,784], index: 4, kind: input, shape index: {}]   ;;  %s1229_s2 = inlined_call_operand.vmem [shape: f32[3,128], index: 2, kind: input, shape index: {}]   ;;  %s1230_s5 = inlined_call_operand.vmem [shape: f32[1,784], index: 5, kind: input, shape index: {}]   ;;  %s1231_s6 = inlined_call_operand.vmem [shape: f32[8,784], index: 6, kind: output, shape index: {}]  }
   0x1   :  { %853 = vset.pattern.permute.xlu0 %v951_v0  ;;  %v25_v1 = vld [vmem:[%s1225_s1] sm:$0xff]  ;;  %842 = vmatprep.subr.bf16.mxu0 %v952_v2  ;;  %v35_v4 = vld [vmem:[%s1227_s3 + $0x8] sm:$0x3]  ;;  %vm844_vm2 = vmpackc.low %vm51_vm0, %vm953_vm1  ;;  %vm954_vm3 = vmmov 0   ;;  %v955_v7 = vmov 0.0   ;;  %v956_v8 = vmov 1   ;;  %v26_v23 = vlaneseq }
   0x2   :  { %v34_v3 = vld [vmem:[%s1227_s3] sm:$0xff]  ;;  %29 = vperm.xlu0 %853, %v25_v1   ;;  %570 = vmatprep.mubr.bf16.mxu1 %v951_v0  ;;  %v861_v10 = vld [vmem:[%s1228_s4 + $0xc] ss:$28 sps:$4 sm:$0xff]   ;;  %v863_v12 = vld [vmem:[%s1228_s4 + $0x3c] ss:$28 sps:$4 sm:$0xff]   ;;  %v957_v13 = vmov 2  }
   0x3   :  { %v24_v5 = vld [vmem:[%s1226_s0] sm:$0xff]  ;;  %v843_v6 = vpack.c.bf16 %v35_v4, %v34_v3  ;;  %819 = vmatprep.mubr.msk.f32.mxu0 %vm954_vm3, %v955_v7  ;;  %854 = vset.pattern.permute.xlu1 %v956_v8  ;;  %v868_v14 = vld [vmem:[%s1228_s4 + $0x38] ss:$28 sps:$4 sm:$0xff]   ;;  %v874_v16 = vld [vmem:[%s1228_s4 + $0x70] ss:$28 sps:$4 sm:$0xff]   ;;  %v27_v24 = vand.u32 127, %v26_v23 }
   0x4   :  { %v857_v9 = vld [vmem:[%s1228_s4 + $0x4] ss:$28 sps:$4 sm:$0xff]   ;;  %127 = vperm.xlu1 %854, %v24_v5   ;;  %v869_v15 = vld [vmem:[%s1228_s4 + $0x74] ss:$28 sps:$4 sm:$0xff]   ;;  %v875_v17 = vld [vmem:[%s1228_s4 + $0xac] ss:$28 sps:$4 sm:$0xff]  }
   0x5   :  { %845 = vmatpush3.bf16.msk.msra.mxu0 %vm844_vm2, %v843_v6  ;;  %538 = vmatprep.subr.bf16.mxu1 %v857_v9  ;;  %v862_v11 = vld [vmem:[%s1228_s4] ss:$28 sps:$4 sm:$0xff]   ;;  %v880_v18 = vld [vmem:[%s1228_s4 + $0xa8] ss:$28 sps:$4 sm:$0xff]   ;;  %v892_v22 = vld [vmem:[%s1228_s4 + $0x118] ss:$28 sps:$4 sm:$0xff]  }
   0x6   :  { %39 = vperm.xlu0 %853, %v24_v5   ;;  %579 = vmatprep.subr.bf16.mxu0 %v861_v10  ;;  %v881_v19 = vld [vmem:[%s1228_s4 + $0xe4] ss:$28 sps:$4 sm:$0xff]   ;;  %v887_v21 = vld [vmem:[%s1228_s4 + $0x11c] ss:$28 sps:$4 sm:$0xff]   ;;  %vm47_vm4 = vcmask 80896   ;;  %vm735_vm6 = vcmask 130048  }
   0x7   :  { %539 = vmatpush1.bf16.msra.mxu1 %v862_v11  ;;  %v886_v20 = vld [vmem:[%s1228_s4 + $0xe0] ss:$28 sps:$4 sm:$0xff]   ;;  %v859_v26 = vld [vmem:[%s1228_s4 + $0x8] ss:$28 sps:$4 sm:$0xff]   ;;  %v871_v31 = vld [vmem:[%s1228_s4 + $0x78] ss:$28 sps:$4 sm:$0xff]  }
   0x8   :  { %855 = vset.pattern.permute.xlu1 %v957_v13  ;;  %540 = vmatprep.subr.bf16.mxu1 %v863_v12  ;;  %v867_v27 = vld [vmem:[%s1228_s4 + $0x44] ss:$28 sps:$4 sm:$0xff]   ;;  %v873_v30 = vld [vmem:[%s1228_s4 + $0x7c] ss:$28 sps:$4 sm:$0xff]   ;;  %v879_v32 = vld [vmem:[%s1228_s4 + $0xb4] ss:$28 sps:$4 sm:$0xff]  }
   0x9   :  { %138 = vperm.xlu1 %855, %v24_v5   ;;  %v865_v29 = vld [vmem:[%s1228_s4 + $0x40] ss:$28 sps:$4 sm:$0xff]   ;;  %v877_v33 = vld [vmem:[%s1228_s4 + $0xb0] ss:$28 sps:$4 sm:$0xff]   ;;  %v883_v35 = vld [vmem:[%s1228_s4 + $0xe8] ss:$28 sps:$4 sm:$0xff]  }
   0xa   :  { %856 = vset.pattern.permute.xlu0 %v957_v13  ;;  %v885_v34 = vld [vmem:[%s1228_s4 + $0xec] ss:$28 sps:$4 sm:$0xff]   ;;  %v891_v36 = vld [vmem:[%s1228_s4 + $0x124] ss:$28 sps:$4 sm:$0xff]   ;;  %v893_v38 = vld [vmem:[%s1228_s4 + $0x154] ss:$28 sps:$4 sm:$0xff]  }
   0xb   :  { %541 = vmatpush1.bf16.msra.mxu1 %v868_v14  ;;  %v889_v37 = vld [vmem:[%s1228_s4 + $0x120] ss:$28 sps:$4 sm:$0xff]   ;;  %v895_v40 = vld [vmem:[%s1228_s4 + $0x158] ss:$28 sps:$4 sm:$0xff]   ;;  %v898_v41 = vld [vmem:[%s1228_s4 + $0x150] ss:$28 sps:$4 sm:$0xff]  }
   0xc   :  { %542 = vmatprep.subr.bf16.mxu1 %v869_v15  ;;  %v897_v39 = vld [vmem:[%s1228_s4 + $0x15c] ss:$28 sps:$4 sm:$0xff]   ;;  %v899_v42 = vld [vmem:[%s1228_s4 + $0x18c] ss:$28 sps:$4 sm:$0xff]   ;;  %v903_v43 = vld [vmem:[%s1228_s4 + $0x194] ss:$28 sps:$4 sm:$0xff]  }
   0xd   :  { %v901_v44 = vld [vmem:[%s1228_s4 + $0x190] ss:$28 sps:$4 sm:$0xff]   ;;  %v904_v45 = vld [vmem:[%s1228_s4 + $0x188] ss:$28 sps:$4 sm:$0xff]   ;;  %v742_v48 = vld [vmem:[%s1229_s2] ss:$0 sm:$0xff] }
   0xe   :  { %v907_v46 = vld [vmem:[%s1228_s4 + $0x14] ss:$28 sps:$4 sm:$0xff]   ;;  %v745_v50 = vld [vmem:[%s1229_s2 + $0x1] ss:$0 sm:$0xff]  ;;  %v746_v51 = vld [vmem:[%s1229_s2 + $0x2] ss:$0 sm:$0xff] }
   0xf   :  { %543 = vmatpush1.bf16.msra.mxu1 %v874_v16  ;;  %v905_v62 = vld [vmem:[%s1228_s4 + $0x10] ss:$28 sps:$4 sm:$0xff]   ;;  %v908_v63 = vld [vmem:[%s1228_s4 + $0x18] ss:$28 sps:$4 sm:$0xff]   ;;  %v909_v3 = vld [vmem:[%s1228_s4 + $0x48] ss:$28 sps:$4 sm:$0xff]  }
  0x10   :  { %544 = vmatprep.subr.bf16.mxu1 %v875_v17  ;;  %v911_v2 = vld [vmem:[%s1228_s4 + $0x4c] ss:$28 sps:$4 sm:$0xff]   ;;  %v915_v5 = vld [vmem:[%s1228_s4 + $0x84] ss:$28 sps:$4 sm:$0xff]   ;;  %v917_v9 = vld [vmem:[%s1228_s4 + $0xb8] ss:$28 sps:$4 sm:$0xff]  }
  0x11   :  { %v912_v4 = vld [vmem:[%s1228_s4 + $0x50] ss:$28 sps:$4 sm:$0xff]   ;;  %v913_v6 = vld [vmem:[%s1228_s4 + $0x80] ss:$28 sps:$4 sm:$0xff]   ;;  %v916_v8 = vld [vmem:[%s1228_s4 + $0x88] ss:$28 sps:$4 sm:$0xff]  }
  0x12   :  { %v920_v10 = vld [vmem:[%s1228_s4 + $0xc0] ss:$28 sps:$4 sm:$0xff]   ;;  %v923_v11 = vld [vmem:[%s1228_s4 + $0xf4] ss:$28 sps:$4 sm:$0xff]   ;;  %v927_v14 = vld [vmem:[%s1228_s4 + $0x12c] ss:$28 sps:$4 sm:$0xff]  }
  0x13   :  { %545 = vmatpush1.bf16.msra.mxu1 %v880_v18  ;;  %v921_v12 = vld [vmem:[%s1228_s4 + $0xf0] ss:$28 sps:$4 sm:$0xff]   ;;  %v924_v13 = vld [vmem:[%s1228_s4 + $0xf8] ss:$28 sps:$4 sm:$0xff]   ;;  %v925_v15 = vld [vmem:[%s1228_s4 + $0x128] ss:$28 sps:$4 sm:$0xff]  }
  0x14   :  { %546 = vmatprep.subr.bf16.mxu1 %v881_v19  ;;  %v928_v16 = vld [vmem:[%s1228_s4 + $0x130] ss:$28 sps:$4 sm:$0xff]   ;;  %v931_v17 = vld [vmem:[%s1228_s4 + $0x164] ss:$28 sps:$4 sm:$0xff]  }
  0x15   :  { %v929_v18 = vld [vmem:[%s1228_s4 + $0x160] ss:$28 sps:$4 sm:$0xff]   ;;  %v932_v19 = vld [vmem:[%s1228_s4 + $0x168] ss:$28 sps:$4 sm:$0xff]  }
  0x17   :  { %547 = vmatpush1.bf16.msra.mxu1 %v886_v20  ;;  %v935_v20 = vld [vmem:[%s1228_s4 + $0x19c] ss:$28 sps:$4 sm:$0xff]  }
  0x18   :  { %548 = vmatprep.subr.bf16.mxu1 %v887_v21  ;;  %v933_v21 = vld [vmem:[%s1228_s4 + $0x198] ss:$28 sps:$4 sm:$0xff]  }
  0x1b   :  { %549 = vmatpush1.bf16.msra.mxu1 %v892_v22  ;;  %v936_v22 = vld [vmem:[%s1228_s4 + $0x1a0] ss:$28 sps:$4 sm:$0xff]  }
  0x1c   :  { %550 = vmatprep.subr.bf16.mxu1 %v893_v38 }
  0x1f   :  { %551 = vmatpush1.bf16.msra.mxu1 %v898_v41 }
  0x20   :  { %552 = vmatprep.subr.bf16.mxu1 %v899_v42 }
  0x23   :  { %553 = vmatpush1.bf16.msra.mxu1 %v904_v45 }
  0x24   :  { %620 = vmatprep.subr.bf16.mxu1 %v907_v46 }
  0x81   :  { %v30_v25 = vpop.permute.xlu0 %29 }
  0x82   :  { %vm31_vm5 = vcmp.eq.s32.totalorder %v27_v24, %v30_v25  ;;  %v216_v24 = vshrl.u32 %v26_v23, 7 }
  0x83   :  { %v741_v28 = vsel %vm31_vm5, 1.0, %v955_v7  ;;  %v128_v47 = vpop.permute.xlu1 %127 }
  0x84   :  { %820 = vmatmul.mubr.msk.f32.vlgmr.msra.gmra.mrb[0].mxu0 %vm47_vm4, %v741_v28  ;;  %v134_v55 = vmul.f32 %v745_v50, %v128_v47  ;;  %v217_v25 = vsub.s32 0, %v216_v24  ;;  %v221_v28 = vsub.s32 1, %v216_v24 }
  0x85   :  { %580 = vmatpush1.bf16.msra.mxu0 %v859_v26  ;;  %611 = vmatprep.mubr.bf16.mxu0 %v951_v0  ;;  %v40_v49 = vpop.permute.xlu0 %39  ;;  %v225_v26 = vsub.s32 2, %v216_v24 }
  0x86   :  { %581 = vmatprep.subr.bf16.mxu0 %v867_v27  ;;  %v46_v53 = vmul.f32 %v742_v48, %v40_v49  ;;  %v213_v27 = vld [vmem:[%s1230_s5] sm:$0x7f] }
  0x88   :  { %v139_v52 = vpop.permute.xlu1 %138 }
  0x89   :  { %582 = vmatpush1.bf16.msra.mxu0 %v865_v29  ;;  %v145_v58 = vmul.f32 %v746_v51, %v139_v52  ;;  %v229_v29 = vsub.s32 3, %v216_v24 }
  0x8a   :  { %583 = vmatprep.subr.bf16.mxu0 %v873_v30  ;;  %v218_v30 = vrot.slane %v213_v27, %v217_v25 }
  0x8d   :  { %584 = vmatpush1.bf16.msra.mxu0 %v871_v31  ;;  %v226_v31 = vrot.slane %v213_v27, %v225_v26 }
  0x8e   :  { %585 = vmatprep.subr.bf16.mxu0 %v879_v32  ;;  %v222_v32 = vrot.slane %v213_v27, %v221_v28 }
  0x91   :  { %586 = vmatpush1.bf16.msra.mxu0 %v877_v33  ;;  %v230_v33 = vrot.slane %v213_v27, %v229_v29 }
  0x92   :  { %587 = vmatprep.subr.bf16.mxu0 %v885_v34 }
  0x95   :  { %588 = vmatpush1.bf16.msra.mxu0 %v883_v35 }
  0x96   :  { %589 = vmatprep.subr.bf16.mxu0 %v891_v36 }
  0x99   :  { %590 = vmatpush1.bf16.msra.mxu0 %v889_v37 }
  0x9a   :  { %591 = vmatprep.subr.bf16.mxu0 %v897_v39 }
  0x9d   :  { %592 = vmatpush1.bf16.msra.mxu0 %v895_v40 }
  0x9e   :  { %593 = vmatprep.subr.bf16.mxu0 %v903_v43 }
  0xa1   :  { %594 = vmatpush1.bf16.msra.mxu0 %v901_v44 }
  0xa2   :  { %822 = vmatprep.subr.bf16.mxu0 %v955_v7 }
 0x157   :  { %v121_v54 = vpop.f32.mrb[0].mxu0 }
 0x158   :  { %v122_v56 = vadd.f32 %v121_v54, %v46_v53  ;;  %v821_v57 = vpop.f32.mrb[1].mxu0 }
 0x15a   :  { %v135_v59 = vadd.f32 %v134_v55, %v122_v56 }
 0x15c   :  { %v146_v60 = vadd.f32 %v145_v58, %v135_v59 }
 0x15e   :  { %v147_v61 = vmax.f32 %v146_v60, 0.0  ;;  %v233_v60 = vsub.s32 4, %v216_v24 }
 0x160   :  { %v148_v1 = vpack.c.bf16 %v147_v61, %v147_v61  ;;  %v241_v61 = vsub.s32 6, %v216_v24 }
 0x162   :  { %571 = vmatmul.mubr.bf16.vlgmr.msra.gmra.mrb[0].mxu1 %v148_v1  ;;  %612 = vmatmul.mubr.bf16.vlgmr.msra.gmra.mrb[4].mxu0 %v148_v1 }
 0x163   :  { %621 = vmatpush1.bf16.msra.mxu1 %v905_v62  ;;  %823 = vmatpush3.bf16.msra.mxu0 %v908_v63  ;;  %v237_v62 = vsub.s32 5, %v216_v24  ;;  %v234_v63 = vrot.slane %v213_v27, %v233_v60 }
 0x164   :  { %622 = vmatprep.subr.bf16.mxu1 %v911_v2  ;;  %824 = vmatprep.subr.bf16.mxu0 %v955_v7 }
 0x165   :  { %652 = vmatprep.mubr.bf16.mxu1 %v951_v0  ;;  %838 = vmatprep.mubr.msk.bf16.mxu0 %vm954_vm3, %v955_v7  ;;  %v919_v0 = vld [vmem:[%s1228_s4 + $0xbc] ss:$28 sps:$4 sm:$0xff]   ;;  %v238_v2 = vrot.slane %v213_v27, %v237_v62 }
 0x167   :  { %623 = vmatpush1.bf16.msra.mxu1 %v909_v3  ;;  %825 = vmatpush3.bf16.msra.mxu0 %v912_v4 }
 0x168   :  { %624 = vmatprep.subr.bf16.mxu1 %v915_v5  ;;  %826 = vmatprep.subr.bf16.mxu0 %v955_v7 }
 0x16b   :  { %625 = vmatpush1.bf16.msra.mxu1 %v913_v6  ;;  %827 = vmatpush3.bf16.msra.mxu0 %v916_v8 }
 0x16c   :  { %626 = vmatprep.subr.bf16.mxu1 %v919_v0  ;;  %828 = vmatprep.subr.bf16.mxu0 %v955_v7 }
 0x16f   :  { %627 = vmatpush1.bf16.msra.mxu1 %v917_v9  ;;  %829 = vmatpush3.bf16.msra.mxu0 %v920_v10 }
 0x170   :  { %628 = vmatprep.subr.bf16.mxu1 %v923_v11  ;;  %830 = vmatprep.subr.bf16.mxu0 %v955_v7 }
 0x173   :  { %629 = vmatpush1.bf16.msra.mxu1 %v921_v12  ;;  %831 = vmatpush3.bf16.msra.mxu0 %v924_v13 }
 0x174   :  { %630 = vmatprep.subr.bf16.mxu1 %v927_v14  ;;  %832 = vmatprep.subr.bf16.mxu0 %v955_v7 }
 0x177   :  { %631 = vmatpush1.bf16.msra.mxu1 %v925_v15  ;;  %833 = vmatpush3.bf16.msra.mxu0 %v928_v16 }
 0x178   :  { %632 = vmatprep.subr.bf16.mxu1 %v931_v17  ;;  %834 = vmatprep.subr.bf16.mxu0 %v955_v7 }
 0x17b   :  { %633 = vmatpush1.bf16.msra.mxu1 %v929_v18  ;;  %835 = vmatpush3.bf16.msra.mxu0 %v932_v19 }
 0x17c   :  { %634 = vmatprep.subr.bf16.mxu1 %v935_v20  ;;  %836 = vmatprep.subr.bf16.mxu0 %v955_v7 }
 0x17f   :  { %635 = vmatpush1.bf16.msra.mxu1 %v933_v21  ;;  %837 = vmatpush3.bf16.msra.mxu0 %v936_v22 }
 0x182   :  { %653 = vmatmul.mubr.bf16.vlgmr.msra.gmra.mrb[4].mxu1 %v148_v1  ;;  %839 = vmatmul.mubr.bf16.vlgmr.msra.gmra.mrb[8].mxu0 %v148_v1  ;;  %v242_v1 = vrot.slane %v213_v27, %v241_v61 }
 0x235   :  { %v572_v34 = vpop.f32.mrb[0].mxu1  ;;  %v613_v7 = vpop.f32.mrb[4].mxu0 }
 0x236   :  { %v573_v35 = vadd.f32 %v572_v34, %v218_v30  ;;  %v614_v36 = vadd.f32 %v613_v7, %v226_v31  ;;  %v574_v37 = vpop.f32.mrb[1].mxu1  ;;  %v615_v38 = vpop.f32.mrb[5].mxu0 }
 0x237   :  { %v575_v39 = vadd.f32 %v574_v37, %v222_v32  ;;  %v616_v23 = vadd.f32 %v615_v38, %v230_v33  ;;  %v576_v40 = vpop.f32.mrb[2].mxu1  ;;  %v617_v41 = vpop.f32.mrb[6].mxu0 }
 0x238   :  { %v701_v42 = vmul.f32 0.5, %v573_v35  ;;  %v703_v43 = vmul.f32 0.5, %v614_v36  ;;  %v577_v44 = vpop.f32.mrb[3].mxu1  ;;  %v618_v45 = vpop.f32.mrb[7].mxu0 }
 0x239   :  { %v702_v46 = vmul.f32 0.5, %v575_v39  ;;  %v704_v47 = vmul.f32 0.5, %v616_v23 }
 0x23a   :  { %937 = vtanh.f32 %v701_v42 }
 0x23b   :  { %939 = vtanh.f32 %v703_v43 }
 0x23c   :  { %941 = vtanh.f32 %v702_v46 }
 0x23d   :  { %943 = vtanh.f32 %v704_v47 }
 0x244   :  { %v938_v48 = vpop.eup %937 }
 0x245   :  { %v940_v49 = vpop.eup %939  ;;  %v715_v50 = vmul.f32 0.5, %v938_v48 }
 0x246   :  { %v942_v51 = vpop.eup %941  ;;  %v717_v52 = vmul.f32 0.5, %v940_v49 }
 0x247   :  { %v944_v53 = vpop.eup %943  ;;  %v722_v54 = vadd.f32 0.5, %v715_v50  ;;  %v716_v55 = vmul.f32 0.5, %v942_v51 }
 0x248   :  { %v724_v56 = vadd.f32 0.5, %v717_v52  ;;  %v718_v57 = vmul.f32 0.5, %v944_v53 }
 0x249   :  { %729 = vst [vmem:[%s1231_s6] sm:$0xff] %v722_v54  ;;  %v723_v58 = vadd.f32 0.5, %v716_v55 }
 0x24a   :  { %731 = vst [vmem:[%s1231_s6 + $0x10] sm:$0xff] %v724_v56  ;;  %v725_v59 = vadd.f32 0.5, %v718_v57 }
 0x24b   :  { %730 = vst [vmem:[%s1231_s6 + $0x8] sm:$0xff] %v723_v58 }
 0x24c   :  { %732 = vst [vmem:[%s1231_s6 + $0x18] sm:$0xff] %v725_v59 }
 0x255   :  { %v654_v3 = vpop.f32.mrb[4].mxu1  ;;  %v695_v4 = vpop.f32.mrb[8].mxu0 }
 0x256   :  { %v655_v5 = vadd.f32 %v654_v3, %v234_v63  ;;  %v696_v6 = vadd.f32 %v695_v4, %v242_v1  ;;  %v656_v8 = vpop.f32.mrb[5].mxu1  ;;  %v840_v0 = vpop.f32.mrb[9].mxu0 }
 0x257   :  { %v657_v9 = vadd.f32 %v656_v8, %v238_v2  ;;  %v658_v10 = vpop.f32.mrb[6].mxu1  ;;  %v698_v11 = vpop.f32.mrb[10].mxu0 }
 0x258   :  { %v705_v12 = vmul.f32 0.5, %v655_v5  ;;  %v707_v13 = vmul.f32 0.5, %v696_v6  ;;  %v659_v14 = vpop.f32.mrb[7].mxu1  ;;  %v841_v15 = vpop.f32.mrb[11].mxu0 }
 0x259   :  { %v706_v16 = vmul.f32 0.5, %v657_v9 }
 0x25a   :  { %945 = vtanh.f32 %v705_v12 }
 0x25b   :  { %947 = vtanh.f32 %v707_v13 }
 0x25c   :  { %949 = vtanh.f32 %v706_v16 }
 0x264   :  { %v946_v17 = vpop.eup %945 }
 0x265   :  { %v948_v18 = vpop.eup %947  ;;  %v719_v19 = vmul.f32 0.5, %v946_v17 }
 0x266   :  { %v950_v20 = vpop.eup %949  ;;  %v721_v21 = vmul.f32 0.5, %v948_v18 }
 0x267   :  { %v726_v22 = vadd.f32 0.5, %v719_v19  ;;  %v720_v24 = vmul.f32 0.5, %v950_v20 }
 0x268   :  { %v728_v25 = vadd.f32 0.5, %v721_v21 }
 0x269   :  { %733 = vst [vmem:[%s1231_s6 + $0x20] sm:$0xff] %v726_v22  ;;  %v727_v26 = vadd.f32 0.5, %v720_v24 }
 0x26a   :  { %736 = vst.msk [vmem:[%s1231_s6 + $0x30] sm:$0xff] %vm735_vm6, %v728_v25 }
 0x26b   :  { %734 = vst [vmem:[%s1231_s6 + $0x28] sm:$0xff] %v727_v26 }

</bundles_post_ra>
